<compile_context>
chip_gen: v7x
topology: tpu7x:2x2x1
jax: 0.10.0
libtpu: 0.0.40
codegen_flags: <defaults>
</compile_context>

<pallas_src>
import math

import jax
import jax.numpy as jnp
from jax.experimental import pallas as pl
from jax.experimental.pallas import tpu as pltpu


def _mp_fourier_kernel(x_ref, scale_ref, shift_ref, o_ref):
    # x_ref:     (TB, 1)  float32  (timestep column for this batch tile;
    #                               resident across the inner channel axis)
    # scale_ref: (1, TC)  float32  (channel tile; re-fetch per step is ~KB, hidden)
    # shift_ref: (1, TC)  float32
    # o_ref:     (TB, TC) float32
    x = x_ref[...]            # (TB, 1)
    scale = scale_ref[...]    # (1, TC)
    shift = shift_ref[...]    # (1, TC)
    # Outer product via VPU broadcast-multiply (NOT an MXU K=1 matmul), then
    # the +shift / *sqrt(2) ride in spare VALU slots under the EUP-bound cos.
    phase = x * scale + shift                       # (TB, TC)
    o_ref[...] = (math.sqrt(2.0) * jnp.cos(phase)).astype(o_ref.dtype)


def _cdiv(a, b):
    return -(-a // b)


def _round_up(a, b):
    return _cdiv(a, b) * b


def _choose_tiles(B, C, *, target_tile_bytes=8 * 1024 * 1024, max_tc=2048, max_tb=8192):
    """Pick (tb, tc, grid_i, grid_j) with no wrapper-side padding required."""
    # ---- channel (lane) tile --------------------------------------------
    # Use the full C whenever it fits: block dim == array dim is always legal,
    # so a non-multiple-of-128 C only means a masked vst on the <128-lane tail.
    if C <= max_tc:
        tc = C
    else:
        gj = _cdiv(C, max_tc)
        tc = _round_up(_cdiv(C, gj), 128)   # last channel block may be partial
    grid_j = _cdiv(C, tc)

    # ---- batch (sublane) tile -------------------------------------------
    if B < 16:
        tb = B                               # full-dim block, single batch tile
    else:
        # Size the output tile toward ~target_tile_bytes (overhead amortization),
        # but guarantee >= 2 batch tiles so both v7x TensorCores get work.
        tb_target = max(8, (target_tile_bytes // (tc * 4)) // 8 * 8)
        split_cap = _round_up(_cdiv(B, 2), 8)        # ensures grid_i >= 2
        tb = max(8, min(tb_target, split_cap, max_tb))
        gi = _cdiv(B, tb)
        tb = _round_up(_cdiv(B, gi), 8)              # rebalance (never grows past tb)
    grid_i = _cdiv(B, tb)
    return tb, tc, grid_i, grid_j


def mp_fourier(x, scale, shift):
    """x: (B,) float32; scale, shift: (C,) float32  ->  (B, C) float32."""
    x = x.astype(jnp.float32)
    scale = scale.astype(jnp.float32)
    shift = shift.astype(jnp.float32)
    B = x.shape[0]
    C = scale.shape[0]

    tb, tc, grid_i, grid_j = _choose_tiles(B, C)

    x2 = x.reshape(B, 1)
    scale2 = scale.reshape(1, C)
    shift2 = shift.reshape(1, C)

    cost = pl.CostEstimate(
        flops=3 * B * C,                       # mul, add, *sqrt(2)
        transcendentals=B * C,                 # cos
        bytes_accessed=4 * (B * C + B + 2 * C),
    )

    out = pl.pallas_call(
        _mp_fourier_kernel,
        out_shape=jax.ShapeDtypeStruct((B, C), jnp.float32),
        grid=(grid_i, grid_j),
        in_specs=[
            # x column: new batch tile per i; stays resident across the inner
            # (channel) grid axis.
            pl.BlockSpec((tb, 1), lambda i, j: (i, 0)),
            # scale/shift: tiled over channels (tiny re-fetch per step).
            pl.BlockSpec((1, tc), lambda i, j: (0, j)),
            pl.BlockSpec((1, tc), lambda i, j: (0, j)),
        ],
        out_specs=pl.BlockSpec((tb, tc), lambda i, j: (i, j)),
        compiler_params=pltpu.CompilerParams(
            dimension_semantics=("parallel", "parallel"),
            vmem_limit_bytes=32 * 1024 * 1024,
        ),
        cost_estimate=cost,
    )(x2, scale2, shift2)
    return out


def mp_fourier_reference(x, scale, shift):
    """Plain-JAX reference matching the PyTorch forward exactly."""
    res = jnp.cos(jnp.outer(x.astype(jnp.float32), scale) + shift)
    return math.sqrt(2.0) * res.astype(jnp.float32)


if __name__ == "__main__":
    # ---- small shape consistent with the module -----------------------------
    num_channels = 32
    batch = 8

    key = jax.random.PRNGKey(0)
    k_scale, k_shift, k_x = jax.random.split(key, 3)

    # Deterministic "buffers" mirroring the PyTorch __init__:
    #   scale = 2*pi * randn(C),  shift = 2*pi * rand(C)
    scale = (2.0 * jnp.pi) * jax.random.normal(k_scale, (num_channels,), dtype=jnp.float32)
    shift = (2.0 * jnp.pi) * jax.random.uniform(k_shift, (num_channels,), dtype=jnp.float32)

    # Input timesteps: 1-D tensor of shape (B,)
    x = jax.random.uniform(k_x, (batch,), dtype=jnp.float32)

    out = jax.block_until_ready(mp_fourier(x, scale, shift))
    ref = mp_fourier_reference(x, scale, shift)
    assert out.shape == (batch, num_channels)
    assert out.dtype == jnp.float32
    assert jnp.allclose(out, ref, atol=1e-5, rtol=1e-5)

    # ---- multi-tile / ragged shape: exercises masked partial blocks ---------
    # B not a multiple of 8, C not a multiple of 128 -> no padding, no slicing;
    # Pallas masks the partial trailing blocks. grid = (2, 1) -> 2 batch tiles.
    big_B, big_C = 1000, 160
    kb_scale, kb_shift, kb_x = jax.random.split(jax.random.PRNGKey(1), 3)
    big_scale = (2.0 * jnp.pi) * jax.random.normal(kb_scale, (big_C,), dtype=jnp.float32)
    big_shift = (2.0 * jnp.pi) * jax.random.uniform(kb_shift, (big_C,), dtype=jnp.float32)
    big_x = jax.random.uniform(kb_x, (big_B,), dtype=jnp.float32)
    big_out = jax.block_until_ready(mp_fourier(big_x, big_scale, big_shift))
    big_ref = mp_fourier_reference(big_x, big_scale, big_shift)
    assert big_out.shape == (big_B, big_C)
    assert jnp.allclose(big_out, big_ref, atol=1e-5, rtol=1e-5)

    # ---- aligned shape: large adaptive batch tiles ---------------------------
    al_B, al_C = 2048, 256
    ka_scale, ka_shift, ka_x = jax.random.split(jax.random.PRNGKey(2), 3)
    al_scale = (2.0 * jnp.pi) * jax.random.normal(ka_scale, (al_C,), dtype=jnp.float32)
    al_shift = (2.0 * jnp.pi) * jax.random.uniform(ka_shift, (al_C,), dtype=jnp.float32)
    al_x = jax.random.uniform(ka_x, (al_B,), dtype=jnp.float32)
    al_out = jax.block_until_ready(mp_fourier(al_x, al_scale, al_shift))
    al_ref = mp_fourier_reference(al_x, al_scale, al_shift)
    assert al_out.shape == (al_B, al_C)
    assert jnp.allclose(al_out, al_ref, atol=1e-5, rtol=1e-5)

    print("KERNEL_OK")
</pallas_src>

<mosaic_0001>
module attributes {stable_mosaic.version = 11 : i64} {
  func.func @_mp_fourier_kernel(%arg0: i32, %arg1: i32, %arg2: memref<8x1xf32, #tpu.memory_space<vmem>>, %arg3: memref<1x32xf32, #tpu.memory_space<vmem>>, %arg4: memref<1x32xf32, #tpu.memory_space<vmem>>, %arg5: memref<8x32xf32, #tpu.memory_space<vmem>>) attributes {dimension_semantics = [#tpu.dimension_semantics<parallel>, #tpu.dimension_semantics<parallel>], iteration_bounds = array<i64: 1, 1>, scalar_prefetch = 0 : i64, scratch_operands = 0 : i64, tpu.core_type = #tpu.core_type<tc>, window_params = [{transform_indices = @transform_0, window_bounds = array<i64: 8, 1>}, {transform_indices = @transform_1, window_bounds = array<i64: 1, 32>}, {transform_indices = @transform_2, window_bounds = array<i64: 1, 32>}, {transform_indices = @transform_3, window_bounds = array<i64: 8, 32>}]} {
    %c0 = arith.constant 0 : index
    %c0_0 = arith.constant 0 : index
    %0 = vector.load %arg2[%c0, %c0_0] : memref<8x1xf32, #tpu.memory_space<vmem>>, vector<8x1xf32>
    %c0_1 = arith.constant 0 : index
    %c0_2 = arith.constant 0 : index
    %1 = vector.load %arg3[%c0_1, %c0_2] : memref<1x32xf32, #tpu.memory_space<vmem>>, vector<1x32xf32>
    %c0_3 = arith.constant 0 : index
    %c0_4 = arith.constant 0 : index
    %2 = vector.load %arg4[%c0_3, %c0_4] : memref<1x32xf32, #tpu.memory_space<vmem>>, vector<1x32xf32>
    %3 = vector.broadcast %0 : vector<8x1xf32> to vector<8x32xf32>
    %4 = vector.broadcast %1 : vector<1x32xf32> to vector<8x32xf32>
    %5 = arith.mulf %3, %4 : vector<8x32xf32>
    %6 = vector.broadcast %2 : vector<1x32xf32> to vector<8x32xf32>
    %7 = arith.addf %5, %6 : vector<8x32xf32>
    %8 = math.cos %7 : vector<8x32xf32>
    %cst = arith.constant 1.41421354 : f32
    %9 = vector.broadcast %cst : f32 to vector<8x32xf32>
    %10 = arith.mulf %9, %8 : vector<8x32xf32>
    %c0_5 = arith.constant 0 : index
    %c0_6 = arith.constant 0 : index
    %11 = vector.load %arg5[%c0_5, %c0_6] : memref<8x32xf32, #tpu.memory_space<vmem>>, vector<8x32xf32>
    tpu.vector_store %arg5[%c0_5, %c0_6], %10 {strides = array<i32>} : memref<8x32xf32, #tpu.memory_space<vmem>>, vector<8x32xf32>,
    return
  }
  func.func @transform_0(%arg0: i32, %arg1: i32) -> (i32, i32) {
    %c0_i32 = arith.constant 0 : i32
    %c0_i32_0 = arith.constant 0 : i32
    return %arg0, %c0_i32 : i32, i32
  }
  func.func @transform_1(%arg0: i32, %arg1: i32) -> (i32, i32) {
    %c0_i32 = arith.constant 0 : i32
    %c0_i32_0 = arith.constant 0 : i32
    return %c0_i32, %arg1 : i32, i32
  }
  func.func @transform_2(%arg0: i32, %arg1: i32) -> (i32, i32) {
    %c0_i32 = arith.constant 0 : i32
    %c0_i32_0 = arith.constant 0 : i32
    return %c0_i32, %arg1 : i32, i32
  }
  func.func @transform_3(%arg0: i32, %arg1: i32) -> (i32, i32) {
    %c0_i32 = arith.constant 0 : i32
    return %arg0, %arg1 : i32, i32
  }
}

</mosaic_0001>

<bundles_post_ra>
// kernel: tpu_custom_call.1
= control target key start
LH: loop header
LB: loop body
LE: loop exit
PB: predicated region body
PF: predicated region fallthrough
CT: control target
= control target key end

     0   :  { %v204_v1 = vmov 0   ;;  %s274_s0 = inlined_call_operand.vmem [shape: f32[8,1], index: 0, kind: input, shape index: {}]   ;;  %s275_s1 = inlined_call_operand.vmem [shape: f32[1,32], index: 1, kind: input, shape index: {}]   ;;  %s276_s2 = inlined_call_operand.vmem [shape: f32[1,32], index: 2, kind: input, shape index: {}]   ;;  %s277_s3 = inlined_call_operand.hbm [shape: f32[8,32], index: 3, kind: output, shape index: {}]  }
   0x1   :  { %v15_v0 = vld [vmem:[%s274_s0] sm:$0xff]  ;;  %175 = vset.pattern.permute.xlu0 %v204_v1 }
   0x2   :  { %20 = vperm.xlu0 %175, %v15_v0  }
   0x3   :  { %8 = vsyncpa [#allocation3], 0  ;;  %v157_v2 = vld [vmem:[%s275_s1] ss:$0 sm:$0xff]  ;;  %v205_v18 = vmov 2102212464  }
   0x4   :  { %v158_v3 = vld [vmem:[%s276_s2] ss:$0 sm:$0xff]  ;;  %v206_v20 = vmov 920167782   ;;  %v207_v24 = vmov 1326507024  }
   0x5   :  { %v208_v26 = vmov 683565275   ;;  %v209_v28 = vmov 2475754826   ;;  %v210_v31 = vmov 2131351028  }
   0x6   :  { %s211_s0 = smov [#allocation2]   ;;  %vm141_vm13 = vcmask 261120  }
   0x7   :  { %s149_s1 = sshll.u32 %s211_s0, 4  ;;  %s150_s1 = int_to_ptr.vmem [resolvable:$true] %s149_s1 }
   0x8   :  { %s180_s2 = scalar_lea.vmem %s150_s1, 128  ;;  %p185_p1 = scmp.lt.s32.totalorder %s150_s1, %s150_s1 }
   0x9   :  { %p181_p0 = scmp.ne.s32.totalorder %s150_s1, %s180_s2  ;;  %p186_p2 = scmp.lt.s32.totalorder %s180_s2, %s180_s2 }
   0xb   :  { %p187_p3 = por %p186_p2, %p185_p1 }
   0xd   :  { %p188_p4 = pnand %p187_p3, %p181_p0 }
  0x81   :  { %v21_v4 = vpop.permute.xlu0 %20 }
  0x82   :  { %v29_v5 = vmul.f32 %v157_v2, %v21_v4 }
  0x84   :  { %v241_v6 = vadd.f32 %v158_v3, %v29_v5 }
  0x86   :  { %v40_v7 = vand.u32 2139095040, %v241_v6  ;;  %v37_v8 = vand.u32 2147483647, %v241_v6  ;;  %vm39_vm7 = vcmp.lt.s32.totalorder %v241_v6, 0  ;;  %vm129_vm12 = vweird.f32 %v241_v6 }
  0x88   :  { %v41_v9 = vshrl.u32 %v40_v7, 23  ;;  %v44_v11 = vand.u32 8388607, %v37_v8  ;;  %vm38_vm8 = vcmp.le.f32.partialorder %v37_v8, 0.7853982 }
  0x8a   :  { %v159_v10 = vadd.s32 4294967169, %v41_v9  ;;  %v45_v14 = vor.u32 8388608, %v44_v11 }
  0x8c   :  { %v47_v12 = vadd.s32 1, %v159_v10  ;;  %v85_v22 = vshll.u32 %v45_v14, 8 }
  0x8e   :  { %vm48_vm0 = vcmp.gt.s32.totalorder %v47_v12, 0 }
  0x8f   :  { %v49_v13 = vsel %vm48_vm0, %v47_v12, 0 }
  0x90   :  { %v51_v15 = vand.u32 31, %v49_v13  ;;  %v50_v16 = vshrl.u32 %v49_v13, 5 }
  0x92   :  { %v52_v17 = vsub.s32 32, %v51_v15  ;;  %v63_v19 = vshll.u32 %v205_v18, %v51_v15  ;;  %v66_v21 = vshll.u32 %v206_v20, %v51_v15  ;;  %v54_v27 = vshll.u32 %v208_v26, %v51_v15 }
  0x93   :  { %v57_v30 = vshll.u32 %v209_v28, %v51_v15  ;;  %v60_v33 = vshll.u32 %v210_v31, %v51_v15  ;;  %vm72_vm1 = vcmp.lt.s32.totalorder %v50_v16, 4  ;;  %vm69_vm2 = vcmp.lt.s32.totalorder %v50_v16, 1 }
  0x94   :  { %v64_v23 = vshrl.u32 %v206_v20, %v52_v17  ;;  %v67_v25 = vshrl.u32 %v207_v24, %v52_v17  ;;  %v55_v29 = vshrl.u32 %v209_v28, %v52_v17  ;;  %v58_v32 = vshrl.u32 %v210_v31, %v52_v17 }
  0x95   :  { %v61_v34 = vshrl.u32 %v205_v18, %v52_v17  ;;  %v53_v38 = vshrl.u32 %v208_v26, %v52_v17  ;;  %vm70_vm3 = vcmp.lt.s32.totalorder %v50_v16, 2  ;;  %vm71_vm4 = vcmp.lt.s32.totalorder %v50_v16, 3 }
  0x96   :  { %v65_v35 = vor.u32 %v64_v23, %v63_v19  ;;  %v68_v36 = vor.u32 %v67_v25, %v66_v21  ;;  %v56_v37 = vor.u32 %v55_v29, %v54_v27  ;;  %v59_v39 = vor.u32 %v58_v32, %v57_v30 }
  0x97   :  { %v62_v40 = vor.u32 %v61_v34, %v60_v33 }
  0x98   :  { %v78_v41 = vsel %vm72_vm1, %v65_v35, 920167782  ;;  %v82_v42 = vsel %vm72_vm1, %v68_v36, 1326507024  ;;  %v77_v44 = vsel %vm69_vm2, %v56_v37, %v59_v39  ;;  %v73_v47 = vsel %vm69_vm2, %v53_v38, %v56_v37 }
  0x99   :  { %v74_v43 = vsel %vm72_vm1, %v62_v40, 2102212464  ;;  %v79_v45 = vsel %vm71_vm4, %v62_v40, %v78_v41  ;;  %v81_v46 = vsel %vm69_vm2, %v59_v39, %v62_v40  ;;  %v83_v50 = vsel %vm71_vm4, %v65_v35, %v82_v42 }
  0x9a   :  { %v75_v48 = vsel %vm71_vm4, %v59_v39, %v74_v43  ;;  %v80_v49 = vsel %vm70_vm3, %v77_v44, %v79_v45  ;;  %v84_v51 = vsel %vm70_vm3, %v81_v46, %v83_v50 }
  0x9b   :  { %v247_v52 = vmul.u32.u64.low %v85_v22, %v80_v49  ;;  %v248_v53 = vmul.u32.u64.high %v85_v22, %v80_v49, %v247_v52  ;;  %v250_v54 = vmul.u32.u64.low %v85_v22, %v84_v51  ;;  %v251_v55 = vmul.u32.u64.high %v85_v22, %v84_v51, %v250_v54 }
  0x9c   :  { %v76_v56 = vsel %vm70_vm3, %v73_v47, %v75_v48 }
  0x9d   :  { %v95_v57 = vadd.s32 1, %v248_v53  ;;  %v92_v58 = vmul.u32 %v85_v22, %v76_v56  ;;  %vm94_vm5 = vc.u32 %v251_v55, %v247_v52  ;;  %v93_v7 = vadd.s32 %v247_v52, %v251_v55 }
  0x9f   :  { %v96_v59 = vsel %vm94_vm5, %v95_v57, %v248_v53 }
  0xa0   :  { %v97_v60 = vadd.s32 %v96_v59, %v92_v58 }
  0xa2   :  { %v98_v61 = vadd.s32 536870912, %v97_v60 }
  0xa4   :  { %v99_v62 = vshrl.u32 %v98_v61, 30 }
  0xa6   :  { %v100_v63 = vshll.u32 %v99_v62, 30  ;;  %v123_v22 = vsub.s32 4, %v99_v62 }
  0xa8   :  { %v101_v0 = vsub.s32 %v97_v60, %v100_v63  ;;  %v124_v24 = vsel %vm39_vm7, %v123_v22, %v99_v62 }
  0xa9   :  { %v126_v25 = vsel %vm38_vm8, 0, %v124_v24 }
  0xaa   :  { %v103_v1 = vsub.s32 0, %v101_v0  ;;  %v130_v26 = vand.u32 3, %v126_v25 }
  0xac   :  { %v160_v2 = vmin.u32 %v103_v1, %v101_v0  ;;  %vm135_vm9 = vcmp.eq.s32.totalorder %v130_v26, 2  ;;  %vm132_vm10 = vcmp.eq.s32.totalorder %v130_v26, 0  ;;  %vm131_vm11 = vcmp.lt.s32.totalorder %v130_v26, 2 }
  0xae   :  { %v105_v3 = vclz %v160_v2 }
  0xb0   :  { %v161_v4 = vadd.s32 4294967294, %v105_v3 }
  0xb2   :  { %vm162_vm6 = vcmp.lt.s32.totalorder %v161_v4, 0 }
  0xb3   :  { %v108_v5 = vsel %vm162_vm6, 0, %v161_v4 }
  0xb4   :  { %v109_v9 = vsub.s32 32, %v108_v5  ;;  %v113_v10 = vsub.s32 4294967266, %v108_v5  ;;  %v110_v11 = vshll.u32 %v101_v0, %v108_v5 }
  0xb6   :  { %v111_v12 = vshrl.u32 %v93_v7, %v109_v9  ;;  %v114_v13 = vadd.s32 127, %v113_v10 }
  0xb8   :  { %v112_v14 = vor.u32 %v111_v12, %v110_v11  ;;  %v115_v15 = vshll.u32 %v114_v13, 23 }
  0xba   :  { %v116_v16 = vor.u32 4788187, %v115_v15  ;;  %v119_v18 = vcvt.s32.f32 %v112_v14 }
  0xbc   :  { %v117_v17 = vand.u32 2147483647, %v116_v16 }
  0xbe   :  { %v120_v19 = vmul.f32 %v119_v18, %v117_v17 }
  0xc0   :  { %v121_v20 = vxor.u32 2147483648, %v120_v19 }
  0xc2   :  { %v122_v21 = vsel %vm39_vm7, %v121_v20, %v120_v19 }
  0xc3   :  { %v125_v23 = vsel %vm38_vm8, %v241_v6, %v122_v21 }
  0xc4   :  { %176 = vcosq.f32 %v125_v23 }
  0xc5   :  { %178 = vsinq.f32 %v125_v23 }
  0xce   :  { %v177_v27 = vpop.eup %176 }
  0xcf   :  { %v179_v28 = vpop.eup %178  ;;  %v136_v29 = vxor.u32 2147483648, %v177_v27 }
  0xd0   :  { %v133_v30 = vxor.u32 2147483648, %v179_v28 }
  0xd1   :  { %v137_v31 = vsel %vm135_vm9, %v136_v29, %v179_v28 }
  0xd2   :  { %v134_v32 = vsel %vm132_vm10, %v177_v27, %v133_v30 }
  0xd3   :  { %v138_v8 = vsel %vm131_vm11, %v134_v32, %v137_v31 }
  0xd4   :  { %v139_v33 = vsel %vm129_vm12, nan, %v138_v8 }
  0xd5   :  { %v140_v34 = vmul.f32 1.4142135, %v139_v33 }
  0xd7   :  { %142 = vst.msk [vmem:[#allocation2] sm:$0xff] %vm141_vm13, %v140_v34 }
  0xd8   :  { %191 = shalt.err (!%p188_p4)
}
  0xd9   :  { %s192_s20 = scalar_lea.hbm %s277_s3, 128 }
  0xda   :  { %p193_p5 = scmp.ne.s32.totalorder %s277_s3, %s192_s20  ;;  %p196_p6 = scmp.lt.u32.totalorder %s192_s20, %s277_s3 }
  0xdc   :  { %p198_p7 = pnand %p196_p6, %p193_p5 }
  0xde   :  { %201 = shalt.err (!%p198_p7)
}
  0xdf   :  { %152 = dma.vmem_to_hbm [thread:$0]  %s150_s1, 128, %s277_s3, [#allocation3]  }
  0xe0   :  { %202 = dma.done.wait [#allocation3], 128  }
  0xe1   :  { %203 = vsyncadd [#allocation3], 4294967168 }
  0xe2   :  { %156 = vsyncpa [#allocation3], 1 }

</bundles_post_ra>
